<compile_context>
chip_gen: v5e
topology: v5e:2x2
jax: 0.10.0
libtpu: 0.0.40
codegen_flags: <defaults>
</compile_context>

<pallas_src>
import functools

import jax
import jax.numpy as jnp
import numpy as np
from jax.experimental import pallas as pl
from jax.experimental.pallas import tpu as pltpu


# ---------------------------------------------------------------------------
# Fused Pallas kernel: full TCNStack forward (all blocks, one batch tile).
# ---------------------------------------------------------------------------
def tcn_stack_kernel(x_ref, dw_ref, pw_ref, w2_ref, bias_ref,
                     out_ref, cache_ref, *, kernel_size, dilations, T):
    """Refs:
      x_ref:     (BB, T, C)           input activations (one batch tile)
      dw_ref:    (n_blocks*K, C)      depthwise taps, BN0 folded in
      pw_ref:    (n_blocks, C, C)     pointwise 1x1 weights, BN1 folded in
      w2_ref:    (n_blocks, C, C)     conv2 1x1 weights, BN2 folded in
      bias_ref:  (3*n_blocks, C)      [bias0, bias1, bias2] per block
      out_ref:   (BB, T, C)           stack output
      cache_ref: (BB, total_pad, C)   concatenated streaming caches
    """
    BB, _, C = x_ref.shape
    K = kernel_size
    n_blocks = len(dilations)
    BT = BB * T

    cur = x_ref[...]                      # (BB, T, C) -- stays in vregs

    cache_off = 0
    for blk in range(n_blocks):           # trace-time block unroll
        dil = dilations[blk]
        pad = dil * (K - 1)

        # Causal left zero-padding as a value (no VMEM scratch round trip).
        apad = jnp.concatenate(
            [jnp.zeros((BB, pad, C), jnp.float32), cur], axis=1)  # (BB, pad+T, C)

        # Streaming cache = last `pad` frames of this block's padded input.
        cache_ref[:, cache_off:cache_off + pad, :] = apad[:, T:T + pad, :]
        cache_off += pad

        # Depthwise dilated conv (groups=C); BN0 pre-folded into taps/bias0.
        h = jnp.zeros((BB, T, C), jnp.float32)
        for k in range(K):
            h = h + apad[:, k * dil:k * dil + T, :] * dw_ref[blk * K + k, :]
        h = h + bias_ref[3 * blk, :]

        # 1x1 convs with batch folded into the matmul M dim (one dot each).
        hf = h.reshape(BT, C)
        y = jnp.dot(hf, pw_ref[blk], preferred_element_type=jnp.float32)
        y = jnp.maximum(y + bias_ref[3 * blk + 1, :], 0.0)       # + folded BN1, ReLU
        z = jnp.dot(y, w2_ref[blk], preferred_element_type=jnp.float32)
        z = z + bias_ref[3 * blk + 2, :]                          # + folded BN2

        # Residual add + ReLU (in_channels == res_channels for the stack).
        cur = jnp.maximum(z.reshape(BB, T, C) + cur, 0.0)

    out_ref[...] = cur                     # single contiguous tile store


# ---------------------------------------------------------------------------
# Wrapper: fused TCNStack forward via a single pallas_call.
# ---------------------------------------------------------------------------
def tcn_stack_forward(x, packed, dilations, kernel_size, *, batch_block=None):
    """x: (B, T, C) float32.  Returns (out (B,T,C), new_cache (B,total_pad,C)).

    batch_block: batch-tile size per grid step.  Default = B (one grid step,
    best on single-TC v5e/v6e).  On v7x use batch_block=B//2 so the "parallel"
    grid axis spreads work over both TensorCores.
    """
    B, T, C = x.shape
    nb = len(dilations)
    K = kernel_size
    pads = [d * (K - 1) for d in dilations]
    total_pad = sum(pads)

    bb = B if batch_block is None else batch_block
    assert B % bb == 0

    kern = functools.partial(tcn_stack_kernel, kernel_size=K,
                             dilations=tuple(dilations), T=T)

    out, cache = pl.pallas_call(
        kern,
        out_shape=(jax.ShapeDtypeStruct((B, T, C), jnp.float32),
                   jax.ShapeDtypeStruct((B, total_pad, C), jnp.float32)),
        grid=(B // bb,),
        in_specs=[
            pl.BlockSpec((bb, T, C), lambda i: (i, 0, 0)),        # x (batch tile)
            pl.BlockSpec((nb * K, C), lambda i: (0, 0)),          # depthwise taps
            pl.BlockSpec((nb, C, C), lambda i: (0, 0, 0)),        # pointwise 1x1
            pl.BlockSpec((nb, C, C), lambda i: (0, 0, 0)),        # conv2 1x1
            pl.BlockSpec((3 * nb, C), lambda i: (0, 0)),          # folded biases
        ],
        out_specs=(
            pl.BlockSpec((bb, T, C), lambda i: (i, 0, 0)),
            pl.BlockSpec((bb, total_pad, C), lambda i: (i, 0, 0)),
        ),
        compiler_params=pltpu.CompilerParams(
            dimension_semantics=("parallel",),
            vmem_limit_bytes=32 * 1024 * 1024),
    )(x, packed["dw"], packed["pw"], packed["w2"], packed["bias"])
    return out, cache


# ---------------------------------------------------------------------------
# Parameter folding / packing (BN + bias folds, one-time constant fold).
# ---------------------------------------------------------------------------
def fold_and_pack(blocks_params, kernel_size):
    dw_list, pw_list, w2_list, bias_list = [], [], [], []
    for p in blocks_params:
        bn0s, bn0b = p["bn0s"][0], p["bn0b"][0]
        bn1s, bn1b = p["bn1s"][0], p["bn1b"][0]
        bn2s, bn2b = p["bn2s"][0], p["bn2b"][0]
        dw_list.append(p["dw_w"] * bn0s)                         # (K, C)
        bias_list.append(p["dw_b"][0] * bn0s + bn0b)             # bias0 (C,)
        pw_list.append(p["pw_w"] * bn1s[None, :])                # (C, Cres)
        bias_list.append(p["pw_b"][0] * bn1s + bn1b)             # bias1
        w2_list.append(p["w2"] * bn2s[None, :])                  # (Cres, Cres)
        bias_list.append(p["b2"][0] * bn2s + bn2b)               # bias2
    return {
        "dw": jnp.concatenate(dw_list, axis=0),                  # (nb*K, C)
        "pw": jnp.stack(pw_list, axis=0),                        # (nb, C, C)
        "w2": jnp.stack(w2_list, axis=0),                        # (nb, C, C)
        "bias": jnp.stack(bias_list, axis=0),                    # (3*nb, C)
    }


# ---------------------------------------------------------------------------
# Pure-JAX reference (raw, unfolded params) for correctness check only.
# ---------------------------------------------------------------------------
def ref_block(x, p, dilation, kernel_size):
    B, T, C = x.shape
    Cres = p["pw_w"].shape[1]
    pad = dilation * (kernel_size - 1)
    xpad = jnp.pad(x, ((0, 0), (pad, 0), (0, 0)))
    h = jnp.zeros((B, T, C), jnp.float32)
    for k in range(kernel_size):
        h = h + xpad[:, k * dilation:k * dilation + T, :] * p["dw_w"][k]
    h = h + p["dw_b"][0]
    h = h * p["bn0s"][0] + p["bn0b"][0]
    y = jnp.einsum("btc,cd->btd", h, p["pw_w"]) + p["pw_b"][0]
    y = jnp.maximum(y * p["bn1s"][0] + p["bn1b"][0], 0.0)
    z = jnp.einsum("btc,cd->btd", y, p["w2"]) + p["b2"][0]
    z = z * p["bn2s"][0] + p["bn2b"][0]
    if C == Cres:
        z = z + x
    return jnp.maximum(z, 0.0), xpad[:, -pad:, :]


def ref_stack(x, blocks_params, dilations, kernel_size):
    out = x
    caches = []
    for p, d in zip(blocks_params, dilations):
        out, c = ref_block(out, p, d, kernel_size)
        caches.append(c)
    return out, jnp.concatenate(caches, axis=1)


# ---------------------------------------------------------------------------
# Deterministic synthetic parameter construction.
# ---------------------------------------------------------------------------
def make_bn(key, c, eps=1e-5):
    k1, k2, k3, k4 = jax.random.split(key, 4)
    gamma = 1.0 + 0.1 * jax.random.normal(k1, (c,), jnp.float32)
    beta = 0.1 * jax.random.normal(k2, (c,), jnp.float32)
    mean = 0.1 * jax.random.normal(k3, (c,), jnp.float32)
    var = 0.5 + jnp.abs(jax.random.normal(k4, (c,), jnp.float32))
    scale = gamma / jnp.sqrt(var + eps)
    shift = beta - mean * scale
    return scale.reshape(1, c), shift.reshape(1, c)


def make_block_params(key, cin, cres, kernel_size):
    ks = jax.random.split(key, 8)
    p = {}
    # torch depthwise weight (Cin, 1, K) -> ours (K, Cin)
    p["dw_w"] = 0.3 * jax.random.normal(ks[0], (kernel_size, cin), jnp.float32)
    p["dw_b"] = 0.1 * jax.random.normal(ks[1], (1, cin), jnp.float32)
    p["bn0s"], p["bn0b"] = make_bn(ks[2], cin)
    # torch pointwise weight (Cres, Cin, 1) -> ours (Cin, Cres)
    p["pw_w"] = 0.3 * jax.random.normal(ks[3], (cin, cres), jnp.float32)
    p["pw_b"] = 0.1 * jax.random.normal(ks[4], (1, cres), jnp.float32)
    p["bn1s"], p["bn1b"] = make_bn(ks[5], cres)
    # torch conv2 weight (Cres, Cres, 1) -> ours (Cres_in, Cres_out)
    p["w2"] = 0.3 * jax.random.normal(ks[6], (cres, cres), jnp.float32)
    p["b2"] = 0.1 * jax.random.normal(ks[7], (1, cres), jnp.float32)
    p["bn2s"], p["bn2b"] = make_bn(jax.random.fold_in(key, 99), cres)
    return p


if __name__ == "__main__":
    # TCNStack config.  The torch module's cache concat (torch.cat along time)
    # only type-checks when in_channels == res_channels, so we require that.
    B, T = 2, 16
    in_channels = 8
    res_channels = 8
    kernel_size = 3
    stack_num = 2
    stack_size = 2
    assert in_channels == res_channels

    # build_dilations(): for s in stack_size: for l in stack_num: 2**l
    dilations = [2 ** l for _ in range(stack_size) for l in range(stack_num)]

    key = jax.random.PRNGKey(0)
    kx, kp = jax.random.split(key)
    # input in (B, T, C) layout (== torch (B, C, T).transpose(1, 2))
    x = jax.random.normal(kx, (B, T, in_channels), jnp.float32)

    blocks_params = []
    cin = in_channels
    for i, d in enumerate(dilations):
        blocks_params.append(
            make_block_params(jax.random.fold_in(kp, i), cin, res_channels,
                              kernel_size))
        cin = res_channels

    packed = fold_and_pack(blocks_params, kernel_size)

    out, new_cache = tcn_stack_forward(x, packed, dilations, kernel_size)
    out = jax.block_until_ready(out)
    new_cache = jax.block_until_ready(new_cache)

    # correctness check against a pure-JAX reference (unfolded BN math)
    ref_out, ref_cache = ref_stack(x, blocks_params, dilations, kernel_size)
    np.testing.assert_allclose(np.asarray(out), np.asarray(ref_out),
                               rtol=1e-3, atol=1e-3)
    np.testing.assert_allclose(np.asarray(new_cache), np.asarray(ref_cache),
                               rtol=1e-3, atol=1e-3)

    total_padding = sum(d * (kernel_size - 1) for d in dilations)
    assert out.shape == (B, T, res_channels)
    assert new_cache.shape == (B, total_padding, in_channels)

    print("KERNEL_OK")
</pallas_src>

<mosaic_0001>
module attributes {stable_mosaic.version = 11 : i64} {
  func.func @tcn_stack_kernel(%arg0: i32, %arg1: memref<2x16x8xf32, #tpu.memory_space<vmem>>, %arg2: memref<12x8xf32, #tpu.memory_space<vmem>>, %arg3: memref<4x8x8xf32, #tpu.memory_space<vmem>>, %arg4: memref<4x8x8xf32, #tpu.memory_space<vmem>>, %arg5: memref<12x8xf32, #tpu.memory_space<vmem>>, %arg6: memref<2x16x8xf32, #tpu.memory_space<vmem>>, %arg7: memref<2x12x8xf32, #tpu.memory_space<vmem>>) attributes {dimension_semantics = [#tpu.dimension_semantics<parallel>], iteration_bounds = array<i64: 1>, scalar_prefetch = 0 : i64, scratch_operands = 0 : i64, tpu.core_type = #tpu.core_type<tc>, window_params = [{transform_indices = @transform_0, window_bounds = array<i64: 2, 16, 8>}, {pipeline_mode = #tpu.pipeline_mode<synchronous>, transform_indices = @transform_1, window_bounds = array<i64: 12, 8>}, {pipeline_mode = #tpu.pipeline_mode<synchronous>, transform_indices = @transform_2, window_bounds = array<i64: 4, 8, 8>}, {pipeline_mode = #tpu.pipeline_mode<synchronous>, transform_indices = @transform_3, window_bounds = array<i64: 4, 8, 8>}, {pipeline_mode = #tpu.pipeline_mode<synchronous>, transform_indices = @transform_4, window_bounds = array<i64: 12, 8>}, {transform_indices = @transform_5, window_bounds = array<i64: 2, 16, 8>}, {transform_indices = @transform_6, window_bounds = array<i64: 2, 12, 8>}]} {
    %c0 = arith.constant 0 : index
    %c0_0 = arith.constant 0 : index
    %c0_1 = arith.constant 0 : index
    %0 = vector.load %arg1[%c0, %c0_0, %c0_1] : memref<2x16x8xf32, #tpu.memory_space<vmem>>, vector<2x16x8xf32>
    %cst = arith.constant 0.000000e+00 : f32
    %1 = vector.broadcast %cst : f32 to vector<2x2x8xf32>
    %2 = tpu.concatenate %1, %0 in 1 : vector<2x2x8xf32>, vector<2x16x8xf32> -> vector<2x18x8xf32>
    %3 = vector.extract_strided_slice %2 {offsets = [0, 16, 0], sizes = [2, 2, 8], strides = [1, 1, 1]} : vector<2x18x8xf32> to vector<2x2x8xf32>
    %c0_2 = arith.constant 0 : index
    %c0_3 = arith.constant 0 : index
    %c0_4 = arith.constant 0 : index
    %4 = vector.load %arg7[%c0_2, %c0_3, %c0_4] : memref<2x12x8xf32, #tpu.memory_space<vmem>>, vector<2x2x8xf32>
    tpu.vector_store %arg7[%c0_2, %c0_3, %c0_4], %3 {strides = array<i32>} : memref<2x12x8xf32, #tpu.memory_space<vmem>>, vector<2x2x8xf32>,
    %cst_5 = arith.constant 0.000000e+00 : f32
    %5 = vector.broadcast %cst_5 : f32 to vector<2x16x8xf32>
    %6 = vector.extract_strided_slice %2 {offsets = [0, 0, 0], sizes = [2, 16, 8], strides = [1, 1, 1]} : vector<2x18x8xf32> to vector<2x16x8xf32>
    %c0_6 = arith.constant 0 : index
    %c0_7 = arith.constant 0 : index
    %7 = vector.load %arg2[%c0_6, %c0_7] : memref<12x8xf32, #tpu.memory_space<vmem>>, vector<1x8xf32>
    %8 = vector.shape_cast %7 : vector<1x8xf32> to vector<8xf32>
    %9 = vector.shape_cast %8 : vector<8xf32> to vector<1x1x8xf32>
    %10 = vector.broadcast %9 : vector<1x1x8xf32> to vector<2x16x8xf32>
    %11 = arith.mulf %6, %10 : vector<2x16x8xf32>
    %12 = arith.addf %5, %11 : vector<2x16x8xf32>
    %13 = vector.extract_strided_slice %2 {offsets = [0, 1, 0], sizes = [2, 16, 8], strides = [1, 1, 1]} : vector<2x18x8xf32> to vector<2x16x8xf32>
    %c1 = arith.constant 1 : index
    %c0_8 = arith.constant 0 : index
    %14 = vector.load %arg2[%c1, %c0_8] : memref<12x8xf32, #tpu.memory_space<vmem>>, vector<1x8xf32>
    %15 = vector.shape_cast %14 : vector<1x8xf32> to vector<8xf32>
    %16 = vector.shape_cast %15 : vector<8xf32> to vector<1x1x8xf32>
    %17 = vector.broadcast %16 : vector<1x1x8xf32> to vector<2x16x8xf32>
    %18 = arith.mulf %13, %17 : vector<2x16x8xf32>
    %19 = arith.addf %12, %18 : vector<2x16x8xf32>
    %20 = vector.extract_strided_slice %2 {offsets = [0, 2, 0], sizes = [2, 16, 8], strides = [1, 1, 1]} : vector<2x18x8xf32> to vector<2x16x8xf32>
    %c2 = arith.constant 2 : index
    %c0_9 = arith.constant 0 : index
    %21 = vector.load %arg2[%c2, %c0_9] : memref<12x8xf32, #tpu.memory_space<vmem>>, vector<1x8xf32>
    %22 = vector.shape_cast %21 : vector<1x8xf32> to vector<8xf32>
    %23 = vector.shape_cast %22 : vector<8xf32> to vector<1x1x8xf32>
    %24 = vector.broadcast %23 : vector<1x1x8xf32> to vector<2x16x8xf32>
    %25 = arith.mulf %20, %24 : vector<2x16x8xf32>
    %26 = arith.addf %19, %25 : vector<2x16x8xf32>
    %c0_10 = arith.constant 0 : index
    %c0_11 = arith.constant 0 : index
    %27 = vector.load %arg5[%c0_10, %c0_11] : memref<12x8xf32, #tpu.memory_space<vmem>>, vector<1x8xf32>
    %28 = vector.shape_cast %27 : vector<1x8xf32> to vector<8xf32>
    %29 = vector.shape_cast %28 : vector<8xf32> to vector<1x1x8xf32>
    %30 = vector.broadcast %29 : vector<1x1x8xf32> to vector<2x16x8xf32>
    %31 = arith.addf %26, %30 : vector<2x16x8xf32>
    %32 = vector.shape_cast %31 : vector<2x16x8xf32> to vector<32x8xf32>
    %c0_12 = arith.constant 0 : index
    %c0_13 = arith.constant 0 : index
    %c0_14 = arith.constant 0 : index
    %33 = vector.load %arg3[%c0_12, %c0_13, %c0_14] : memref<4x8x8xf32, #tpu.memory_space<vmem>>, vector<1x8x8xf32>
    %34 = vector.shape_cast %33 : vector<1x8x8xf32> to vector<8x8xf32>
    %cst_15 = arith.constant dense<0.000000e+00> : vector<32x8xf32>
    %35 = tpu.matmul %32, %34, %cst_15 {dimension_numbers = #tpu.dot_dimension_numbers<[1], [0], [0], [1], [0, 0, 1, 1], [], []>} : vector<32x8xf32>, vector<8x8xf32>, vector<32x8xf32> -> vector<32x8xf32>
    %c1_16 = arith.constant 1 : index
    %c0_17 = arith.constant 0 : index
    %36 = vector.load %arg5[%c1_16, %c0_17] : memref<12x8xf32, #tpu.memory_space<vmem>>, vector<1x8xf32>
    %37 = vector.shape_cast %36 : vector<1x8xf32> to vector<8xf32>
    %38 = vector.shape_cast %37 : vector<8xf32> to vector<1x8xf32>
    %39 = vector.broadcast %38 : vector<1x8xf32> to vector<32x8xf32>
    %40 = arith.addf %35, %39 : vector<32x8xf32>
    %cst_18 = arith.constant 0.000000e+00 : f32
    %41 = vector.broadcast %cst_18 : f32 to vector<32x8xf32>
    %42 = arith.maximumf %40, %41 : vector<32x8xf32>
    %c0_19 = arith.constant 0 : index
    %c0_20 = arith.constant 0 : index
    %c0_21 = arith.constant 0 : index
    %43 = vector.load %arg4[%c0_19, %c0_20, %c0_21] : memref<4x8x8xf32, #tpu.memory_space<vmem>>, vector<1x8x8xf32>
    %44 = vector.shape_cast %43 : vector<1x8x8xf32> to vector<8x8xf32>
    %cst_22 = arith.constant dense<0.000000e+00> : vector<32x8xf32>
    %45 = tpu.matmul %42, %44, %cst_22 {dimension_numbers = #tpu.dot_dimension_numbers<[1], [0], [0], [1], [0, 0, 1, 1], [], []>} : vector<32x8xf32>, vector<8x8xf32>, vector<32x8xf32> -> vector<32x8xf32>
    %c2_23 = arith.constant 2 : index
    %c0_24 = arith.constant 0 : index
    %46 = vector.load %arg5[%c2_23, %c0_24] : memref<12x8xf32, #tpu.memory_space<vmem>>, vector<1x8xf32>
    %47 = vector.shape_cast %46 : vector<1x8xf32> to vector<8xf32>
    %48 = vector.shape_cast %47 : vector<8xf32> to vector<1x8xf32>
    %49 = vector.broadcast %48 : vector<1x8xf32> to vector<32x8xf32>
    %50 = arith.addf %45, %49 : vector<32x8xf32>
    %51 = vector.shape_cast %50 : vector<32x8xf32> to vector<2x16x8xf32>
    %52 = arith.addf %51, %0 : vector<2x16x8xf32>
    %cst_25 = arith.constant 0.000000e+00 : f32
    %53 = vector.broadcast %cst_25 : f32 to vector<2x16x8xf32>
    %54 = arith.maximumf %52, %53 : vector<2x16x8xf32>
    %cst_26 = arith.constant 0.000000e+00 : f32
    %55 = vector.broadcast %cst_26 : f32 to vector<2x4x8xf32>
    %56 = tpu.concatenate %55, %54 in 1 : vector<2x4x8xf32>, vector<2x16x8xf32> -> vector<2x20x8xf32>
    %57 = vector.extract_strided_slice %56 {offsets = [0, 16, 0], sizes = [2, 4, 8], strides = [1, 1, 1]} : vector<2x20x8xf32> to vector<2x4x8xf32>
    %c0_27 = arith.constant 0 : index
    %c2_28 = arith.constant 2 : index
    %c0_29 = arith.constant 0 : index
    %58 = vector.load %arg7[%c0_27, %c2_28, %c0_29] : memref<2x12x8xf32, #tpu.memory_space<vmem>>, vector<2x4x8xf32>
    tpu.vector_store %arg7[%c0_27, %c2_28, %c0_29], %57 {strides = array<i32>} : memref<2x12x8xf32, #tpu.memory_space<vmem>>, vector<2x4x8xf32>,
    %cst_30 = arith.constant 0.000000e+00 : f32
    %59 = vector.broadcast %cst_30 : f32 to vector<2x16x8xf32>
    %60 = vector.extract_strided_slice %56 {offsets = [0, 0, 0], sizes = [2, 16, 8], strides = [1, 1, 1]} : vector<2x20x8xf32> to vector<2x16x8xf32>
    %c3 = arith.constant 3 : index
    %c0_31 = arith.constant 0 : index
    %61 = vector.load %arg2[%c3, %c0_31] : memref<12x8xf32, #tpu.memory_space<vmem>>, vector<1x8xf32>
    %62 = vector.shape_cast %61 : vector<1x8xf32> to vector<8xf32>
    %63 = vector.shape_cast %62 : vector<8xf32> to vector<1x1x8xf32>
    %64 = vector.broadcast %63 : vector<1x1x8xf32> to vector<2x16x8xf32>
    %65 = arith.mulf %60, %64 : vector<2x16x8xf32>
    %66 = arith.addf %59, %65 : vector<2x16x8xf32>
    %67 = vector.extract_strided_slice %56 {offsets = [0, 2, 0], sizes = [2, 16, 8], strides = [1, 1, 1]} : vector<2x20x8xf32> to vector<2x16x8xf32>
    %c4 = arith.constant 4 : index
    %c0_32 = arith.constant 0 : index
    %68 = vector.load %arg2[%c4, %c0_32] : memref<12x8xf32, #tpu.memory_space<vmem>>, vector<1x8xf32>
    %69 = vector.shape_cast %68 : vector<1x8xf32> to vector<8xf32>
    %70 = vector.shape_cast %69 : vector<8xf32> to vector<1x1x8xf32>
    %71 = vector.broadcast %70 : vector<1x1x8xf32> to vector<2x16x8xf32>
    %72 = arith.mulf %67, %71 : vector<2x16x8xf32>
    %73 = arith.addf %66, %72 : vector<2x16x8xf32>
    %74 = vector.extract_strided_slice %56 {offsets = [0, 4, 0], sizes = [2, 16, 8], strides = [1, 1, 1]} : vector<2x20x8xf32> to vector<2x16x8xf32>
    %c5 = arith.constant 5 : index
    %c0_33 = arith.constant 0 : index
    %75 = vector.load %arg2[%c5, %c0_33] : memref<12x8xf32, #tpu.memory_space<vmem>>, vector<1x8xf32>
    %76 = vector.shape_cast %75 : vector<1x8xf32> to vector<8xf32>
    %77 = vector.shape_cast %76 : vector<8xf32> to vector<1x1x8xf32>
    %78 = vector.broadcast %77 : vector<1x1x8xf32> to vector<2x16x8xf32>
    %79 = arith.mulf %74, %78 : vector<2x16x8xf32>
    %80 = arith.addf %73, %79 : vector<2x16x8xf32>
    %c3_34 = arith.constant 3 : index
    %c0_35 = arith.constant 0 : index
    %81 = vector.load %arg5[%c3_34, %c0_35] : memref<12x8xf32, #tpu.memory_space<vmem>>, vector<1x8xf32>
    %82 = vector.shape_cast %81 : vector<1x8xf32> to vector<8xf32>
    %83 = vector.shape_cast %82 : vector<8xf32> to vector<1x1x8xf32>
    %84 = vector.broadcast %83 : vector<1x1x8xf32> to vector<2x16x8xf32>
    %85 = arith.addf %80, %84 : vector<2x16x8xf32>
    %86 = vector.shape_cast %85 : vector<2x16x8xf32> to vector<32x8xf32>
    %c1_36 = arith.constant 1 : index
    %c0_37 = arith.constant 0 : index
    %c0_38 = arith.constant 0 : index
    %87 = vector.load %arg3[%c1_36, %c0_37, %c0_38] : memref<4x8x8xf32, #tpu.memory_space<vmem>>, vector<1x8x8xf32>
    %88 = vector.shape_cast %87 : vector<1x8x8xf32> to vector<8x8xf32>
    %cst_39 = arith.constant dense<0.000000e+00> : vector<32x8xf32>
    %89 = tpu.matmul %86, %88, %cst_39 {dimension_numbers = #tpu.dot_dimension_numbers<[1], [0], [0], [1], [0, 0, 1, 1], [], []>} : vector<32x8xf32>, vector<8x8xf32>, vector<32x8xf32> -> vector<32x8xf32>
    %c4_40 = arith.constant 4 : index
    %c0_41 = arith.constant 0 : index
    %90 = vector.load %arg5[%c4_40, %c0_41] : memref<12x8xf32, #tpu.memory_space<vmem>>, vector<1x8xf32>
    %91 = vector.shape_cast %90 : vector<1x8xf32> to vector<8xf32>
    %92 = vector.shape_cast %91 : vector<8xf32> to vector<1x8xf32>
    %93 = vector.broadcast %92 : vector<1x8xf32> to vector<32x8xf32>
    %94 = arith.addf %89, %93 : vector<32x8xf32>
    %cst_42 = arith.constant 0.000000e+00 : f32
    %95 = vector.broadcast %cst_42 : f32 to vector<32x8xf32>
    %96 = arith.maximumf %94, %95 : vector<32x8xf32>
    %c1_43 = arith.constant 1 : index
    %c0_44 = arith.constant 0 : index
    %c0_45 = arith.constant 0 : index
    %97 = vector.load %arg4[%c1_43, %c0_44, %c0_45] : memref<4x8x8xf32, #tpu.memory_space<vmem>>, vector<1x8x8xf32>
    %98 = vector.shape_cast %97 : vector<1x8x8xf32> to vector<8x8xf32>
    %cst_46 = arith.constant dense<0.000000e+00> : vector<32x8xf32>
    %99 = tpu.matmul %96, %98, %cst_46 {dimension_numbers = #tpu.dot_dimension_numbers<[1], [0], [0], [1], [0, 0, 1, 1], [], []>} : vector<32x8xf32>, vector<8x8xf32>, vector<32x8xf32> -> vector<32x8xf32>
    %c5_47 = arith.constant 5 : index
    %c0_48 = arith.constant 0 : index
    %100 = vector.load %arg5[%c5_47, %c0_48] : memref<12x8xf32, #tpu.memory_space<vmem>>, vector<1x8xf32>
    %101 = vector.shape_cast %100 : vector<1x8xf32> to vector<8xf32>
    %102 = vector.shape_cast %101 : vector<8xf32> to vector<1x8xf32>
    %103 = vector.broadcast %102 : vector<1x8xf32> to vector<32x8xf32>
    %104 = arith.addf %99, %103 : vector<32x8xf32>
    %105 = vector.shape_cast %104 : vector<32x8xf32> to vector<2x16x8xf32>
    %106 = arith.addf %105, %54 : vector<2x16x8xf32>
    %cst_49 = arith.constant 0.000000e+00 : f32
    %107 = vector.broadcast %cst_49 : f32 to vector<2x16x8xf32>
    %108 = arith.maximumf %106, %107 : vector<2x16x8xf32>
    %cst_50 = arith.constant 0.000000e+00 : f32
    %109 = vector.broadcast %cst_50 : f32 to vector<2x2x8xf32>
    %110 = tpu.concatenate %109, %108 in 1 : vector<2x2x8xf32>, vector<2x16x8xf32> -> vector<2x18x8xf32>
    %111 = vector.extract_strided_slice %110 {offsets = [0, 16, 0], sizes = [2, 2, 8], strides = [1, 1, 1]} : vector<2x18x8xf32> to vector<2x2x8xf32>
    %c0_51 = arith.constant 0 : index
    %c6 = arith.constant 6 : index
    %c0_52 = arith.constant 0 : index
    %112 = vector.load %arg7[%c0_51, %c6, %c0_52] : memref<2x12x8xf32, #tpu.memory_space<vmem>>, vector<2x2x8xf32>
    tpu.vector_store %arg7[%c0_51, %c6, %c0_52], %111 {strides = array<i32>} : memref<2x12x8xf32, #tpu.memory_space<vmem>>, vector<2x2x8xf32>,
    %cst_53 = arith.constant 0.000000e+00 : f32
    %113 = vector.broadcast %cst_53 : f32 to vector<2x16x8xf32>
    %114 = vector.extract_strided_slice %110 {offsets = [0, 0, 0], sizes = [2, 16, 8], strides = [1, 1, 1]} : vector<2x18x8xf32> to vector<2x16x8xf32>
    %c6_54 = arith.constant 6 : index
    %c0_55 = arith.constant 0 : index
    %115 = vector.load %arg2[%c6_54, %c0_55] : memref<12x8xf32, #tpu.memory_space<vmem>>, vector<1x8xf32>
    %116 = vector.shape_cast %115 : vector<1x8xf32> to vector<8xf32>
    %117 = vector.shape_cast %116 : vector<8xf32> to vector<1x1x8xf32>
    %118 = vector.broadcast %117 : vector<1x1x8xf32> to vector<2x16x8xf32>
    %119 = arith.mulf %114, %118 : vector<2x16x8xf32>
    %120 = arith.addf %113, %119 : vector<2x16x8xf32>
    %121 = vector.extract_strided_slice %110 {offsets = [0, 1, 0], sizes = [2, 16, 8], strides = [1, 1, 1]} : vector<2x18x8xf32> to vector<2x16x8xf32>
    %c7 = arith.constant 7 : index
    %c0_56 = arith.constant 0 : index
    %122 = vector.load %arg2[%c7, %c0_56] : memref<12x8xf32, #tpu.memory_space<vmem>>, vector<1x8xf32>
    %123 = vector.shape_cast %122 : vector<1x8xf32> to vector<8xf32>
    %124 = vector.shape_cast %123 : vector<8xf32> to vector<1x1x8xf32>
    %125 = vector.broadcast %124 : vector<1x1x8xf32> to vector<2x16x8xf32>
    %126 = arith.mulf %121, %125 : vector<2x16x8xf32>
    %127 = arith.addf %120, %126 : vector<2x16x8xf32>
    %128 = vector.extract_strided_slice %110 {offsets = [0, 2, 0], sizes = [2, 16, 8], strides = [1, 1, 1]} : vector<2x18x8xf32> to vector<2x16x8xf32>
    %c8 = arith.constant 8 : index
    %c0_57 = arith.constant 0 : index
    %129 = vector.load %arg2[%c8, %c0_57] : memref<12x8xf32, #tpu.memory_space<vmem>>, vector<1x8xf32>
    %130 = vector.shape_cast %129 : vector<1x8xf32> to vector<8xf32>
    %131 = vector.shape_cast %130 : vector<8xf32> to vector<1x1x8xf32>
    %132 = vector.broadcast %131 : vector<1x1x8xf32> to vector<2x16x8xf32>
    %133 = arith.mulf %128, %132 : vector<2x16x8xf32>
    %134 = arith.addf %127, %133 : vector<2x16x8xf32>
    %c6_58 = arith.constant 6 : index
    %c0_59 = arith.constant 0 : index
    %135 = vector.load %arg5[%c6_58, %c0_59] : memref<12x8xf32, #tpu.memory_space<vmem>>, vector<1x8xf32>
    %136 = vector.shape_cast %135 : vector<1x8xf32> to vector<8xf32>
    %137 = vector.shape_cast %136 : vector<8xf32> to vector<1x1x8xf32>
    %138 = vector.broadcast %137 : vector<1x1x8xf32> to vector<2x16x8xf32>
    %139 = arith.addf %134, %138 : vector<2x16x8xf32>
    %140 = vector.shape_cast %139 : vector<2x16x8xf32> to vector<32x8xf32>
    %c2_60 = arith.constant 2 : index
    %c0_61 = arith.constant 0 : index
    %c0_62 = arith.constant 0 : index
    %141 = vector.load %arg3[%c2_60, %c0_61, %c0_62] : memref<4x8x8xf32, #tpu.memory_space<vmem>>, vector<1x8x8xf32>
    %142 = vector.shape_cast %141 : vector<1x8x8xf32> to vector<8x8xf32>
    %cst_63 = arith.constant dense<0.000000e+00> : vector<32x8xf32>
    %143 = tpu.matmul %140, %142, %cst_63 {dimension_numbers = #tpu.dot_dimension_numbers<[1], [0], [0], [1], [0, 0, 1, 1], [], []>} : vector<32x8xf32>, vector<8x8xf32>, vector<32x8xf32> -> vector<32x8xf32>
    %c7_64 = arith.constant 7 : index
    %c0_65 = arith.constant 0 : index
    %144 = vector.load %arg5[%c7_64, %c0_65] : memref<12x8xf32, #tpu.memory_space<vmem>>, vector<1x8xf32>
    %145 = vector.shape_cast %144 : vector<1x8xf32> to vector<8xf32>
    %146 = vector.shape_cast %145 : vector<8xf32> to vector<1x8xf32>
    %147 = vector.broadcast %146 : vector<1x8xf32> to vector<32x8xf32>
    %148 = arith.addf %143, %147 : vector<32x8xf32>
    %cst_66 = arith.constant 0.000000e+00 : f32
    %149 = vector.broadcast %cst_66 : f32 to vector<32x8xf32>
    %150 = arith.maximumf %148, %149 : vector<32x8xf32>
    %c2_67 = arith.constant 2 : index
    %c0_68 = arith.constant 0 : index
    %c0_69 = arith.constant 0 : index
    %151 = vector.load %arg4[%c2_67, %c0_68, %c0_69] : memref<4x8x8xf32, #tpu.memory_space<vmem>>, vector<1x8x8xf32>
    %152 = vector.shape_cast %151 : vector<1x8x8xf32> to vector<8x8xf32>
    %cst_70 = arith.constant dense<0.000000e+00> : vector<32x8xf32>
    %153 = tpu.matmul %150, %152, %cst_70 {dimension_numbers = #tpu.dot_dimension_numbers<[1], [0], [0], [1], [0, 0, 1, 1], [], []>} : vector<32x8xf32>, vector<8x8xf32>, vector<32x8xf32> -> vector<32x8xf32>
    %c8_71 = arith.constant 8 : index
    %c0_72 = arith.constant 0 : index
    %154 = vector.load %arg5[%c8_71, %c0_72] : memref<12x8xf32, #tpu.memory_space<vmem>>, vector<1x8xf32>
    %155 = vector.shape_cast %154 : vector<1x8xf32> to vector<8xf32>
    %156 = vector.shape_cast %155 : vector<8xf32> to vector<1x8xf32>
    %157 = vector.broadcast %156 : vector<1x8xf32> to vector<32x8xf32>
    %158 = arith.addf %153, %157 : vector<32x8xf32>
    %159 = vector.shape_cast %158 : vector<32x8xf32> to vector<2x16x8xf32>
    %160 = arith.addf %159, %108 : vector<2x16x8xf32>
    %cst_73 = arith.constant 0.000000e+00 : f32
    %161 = vector.broadcast %cst_73 : f32 to vector<2x16x8xf32>
    %162 = arith.maximumf %160, %161 : vector<2x16x8xf32>
    %cst_74 = arith.constant 0.000000e+00 : f32
    %163 = vector.broadcast %cst_74 : f32 to vector<2x4x8xf32>
    %164 = tpu.concatenate %163, %162 in 1 : vector<2x4x8xf32>, vector<2x16x8xf32> -> vector<2x20x8xf32>
    %165 = vector.extract_strided_slice %164 {offsets = [0, 16, 0], sizes = [2, 4, 8], strides = [1, 1, 1]} : vector<2x20x8xf32> to vector<2x4x8xf32>
    %c0_75 = arith.constant 0 : index
    %c8_76 = arith.constant 8 : index
    %c0_77 = arith.constant 0 : index
    %166 = vector.load %arg7[%c0_75, %c8_76, %c0_77] : memref<2x12x8xf32, #tpu.memory_space<vmem>>, vector<2x4x8xf32>
    tpu.vector_store %arg7[%c0_75, %c8_76, %c0_77], %165 {strides = array<i32>} : memref<2x12x8xf32, #tpu.memory_space<vmem>>, vector<2x4x8xf32>,
    %cst_78 = arith.constant 0.000000e+00 : f32
    %167 = vector.broadcast %cst_78 : f32 to vector<2x16x8xf32>
    %168 = vector.extract_strided_slice %164 {offsets = [0, 0, 0], sizes = [2, 16, 8], strides = [1, 1, 1]} : vector<2x20x8xf32> to vector<2x16x8xf32>
    %c9 = arith.constant 9 : index
    %c0_79 = arith.constant 0 : index
    %169 = vector.load %arg2[%c9, %c0_79] : memref<12x8xf32, #tpu.memory_space<vmem>>, vector<1x8xf32>
    %170 = vector.shape_cast %169 : vector<1x8xf32> to vector<8xf32>
    %171 = vector.shape_cast %170 : vector<8xf32> to vector<1x1x8xf32>
    %172 = vector.broadcast %171 : vector<1x1x8xf32> to vector<2x16x8xf32>
    %173 = arith.mulf %168, %172 : vector<2x16x8xf32>
    %174 = arith.addf %167, %173 : vector<2x16x8xf32>
    %175 = vector.extract_strided_slice %164 {offsets = [0, 2, 0], sizes = [2, 16, 8], strides = [1, 1, 1]} : vector<2x20x8xf32> to vector<2x16x8xf32>
    %c10 = arith.constant 10 : index
    %c0_80 = arith.constant 0 : index
    %176 = vector.load %arg2[%c10, %c0_80] : memref<12x8xf32, #tpu.memory_space<vmem>>, vector<1x8xf32>
    %177 = vector.shape_cast %176 : vector<1x8xf32> to vector<8xf32>
    %178 = vector.shape_cast %177 : vector<8xf32> to vector<1x1x8xf32>
    %179 = vector.broadcast %178 : vector<1x1x8xf32> to vector<2x16x8xf32>
    %180 = arith.mulf %175, %179 : vector<2x16x8xf32>
    %181 = arith.addf %174, %180 : vector<2x16x8xf32>
    %182 = vector.extract_strided_slice %164 {offsets = [0, 4, 0], sizes = [2, 16, 8], strides = [1, 1, 1]} : vector<2x20x8xf32> to vector<2x16x8xf32>
    %c11 = arith.constant 11 : index
    %c0_81 = arith.constant 0 : index
    %183 = vector.load %arg2[%c11, %c0_81] : memref<12x8xf32, #tpu.memory_space<vmem>>, vector<1x8xf32>
    %184 = vector.shape_cast %183 : vector<1x8xf32> to vector<8xf32>
    %185 = vector.shape_cast %184 : vector<8xf32> to vector<1x1x8xf32>
    %186 = vector.broadcast %185 : vector<1x1x8xf32> to vector<2x16x8xf32>
    %187 = arith.mulf %182, %186 : vector<2x16x8xf32>
    %188 = arith.addf %181, %187 : vector<2x16x8xf32>
    %c9_82 = arith.constant 9 : index
    %c0_83 = arith.constant 0 : index
    %189 = vector.load %arg5[%c9_82, %c0_83] : memref<12x8xf32, #tpu.memory_space<vmem>>, vector<1x8xf32>
    %190 = vector.shape_cast %189 : vector<1x8xf32> to vector<8xf32>
    %191 = vector.shape_cast %190 : vector<8xf32> to vector<1x1x8xf32>
    %192 = vector.broadcast %191 : vector<1x1x8xf32> to vector<2x16x8xf32>
    %193 = arith.addf %188, %192 : vector<2x16x8xf32>
    %194 = vector.shape_cast %193 : vector<2x16x8xf32> to vector<32x8xf32>
    %c3_84 = arith.constant 3 : index
    %c0_85 = arith.constant 0 : index
    %c0_86 = arith.constant 0 : index
    %195 = vector.load %arg3[%c3_84, %c0_85, %c0_86] : memref<4x8x8xf32, #tpu.memory_space<vmem>>, vector<1x8x8xf32>
    %196 = vector.shape_cast %195 : vector<1x8x8xf32> to vector<8x8xf32>
    %cst_87 = arith.constant dense<0.000000e+00> : vector<32x8xf32>
    %197 = tpu.matmul %194, %196, %cst_87 {dimension_numbers = #tpu.dot_dimension_numbers<[1], [0], [0], [1], [0, 0, 1, 1], [], []>} : vector<32x8xf32>, vector<8x8xf32>, vector<32x8xf32> -> vector<32x8xf32>
    %c10_88 = arith.constant 10 : index
    %c0_89 = arith.constant 0 : index
    %198 = vector.load %arg5[%c10_88, %c0_89] : memref<12x8xf32, #tpu.memory_space<vmem>>, vector<1x8xf32>
    %199 = vector.shape_cast %198 : vector<1x8xf32> to vector<8xf32>
    %200 = vector.shape_cast %199 : vector<8xf32> to vector<1x8xf32>
    %201 = vector.broadcast %200 : vector<1x8xf32> to vector<32x8xf32>
    %202 = arith.addf %197, %201 : vector<32x8xf32>
    %cst_90 = arith.constant 0.000000e+00 : f32
    %203 = vector.broadcast %cst_90 : f32 to vector<32x8xf32>
    %204 = arith.maximumf %202, %203 : vector<32x8xf32>
    %c3_91 = arith.constant 3 : index
    %c0_92 = arith.constant 0 : index
    %c0_93 = arith.constant 0 : index
    %205 = vector.load %arg4[%c3_91, %c0_92, %c0_93] : memref<4x8x8xf32, #tpu.memory_space<vmem>>, vector<1x8x8xf32>
    %206 = vector.shape_cast %205 : vector<1x8x8xf32> to vector<8x8xf32>
    %cst_94 = arith.constant dense<0.000000e+00> : vector<32x8xf32>
    %207 = tpu.matmul %204, %206, %cst_94 {dimension_numbers = #tpu.dot_dimension_numbers<[1], [0], [0], [1], [0, 0, 1, 1], [], []>} : vector<32x8xf32>, vector<8x8xf32>, vector<32x8xf32> -> vector<32x8xf32>
    %c11_95 = arith.constant 11 : index
    %c0_96 = arith.constant 0 : index
    %208 = vector.load %arg5[%c11_95, %c0_96] : memref<12x8xf32, #tpu.memory_space<vmem>>, vector<1x8xf32>
    %209 = vector.shape_cast %208 : vector<1x8xf32> to vector<8xf32>
    %210 = vector.shape_cast %209 : vector<8xf32> to vector<1x8xf32>
    %211 = vector.broadcast %210 : vector<1x8xf32> to vector<32x8xf32>
    %212 = arith.addf %207, %211 : vector<32x8xf32>
    %213 = vector.shape_cast %212 : vector<32x8xf32> to vector<2x16x8xf32>
    %214 = arith.addf %213, %162 : vector<2x16x8xf32>
    %cst_97 = arith.constant 0.000000e+00 : f32
    %215 = vector.broadcast %cst_97 : f32 to vector<2x16x8xf32>
    %216 = arith.maximumf %214, %215 : vector<2x16x8xf32>
    %c0_98 = arith.constant 0 : index
    %c0_99 = arith.constant 0 : index
    %c0_100 = arith.constant 0 : index
    %217 = vector.load %arg6[%c0_98, %c0_99, %c0_100] : memref<2x16x8xf32, #tpu.memory_space<vmem>>, vector<2x16x8xf32>
    tpu.vector_store %arg6[%c0_98, %c0_99, %c0_100], %216 {strides = array<i32>} : memref<2x16x8xf32, #tpu.memory_space<vmem>>, vector<2x16x8xf32>,
    return
  }
  func.func @transform_0(%arg0: i32) -> (i32, i32, i32) {
    %c0_i32 = arith.constant 0 : i32
    %c0_i32_0 = arith.constant 0 : i32
    %c0_i32_1 = arith.constant 0 : i32
    return %arg0, %c0_i32, %c0_i32_0 : i32, i32, i32
  }
  func.func @transform_1(%arg0: i32) -> (i32, i32) {
    %c0_i32 = arith.constant 0 : i32
    %c0_i32_0 = arith.constant 0 : i32
    %c0_i32_1 = arith.constant 0 : i32
    return %c0_i32, %c0_i32_0 : i32, i32
  }
  func.func @transform_2(%arg0: i32) -> (i32, i32, i32) {
    %c0_i32 = arith.constant 0 : i32
    %c0_i32_0 = arith.constant 0 : i32
    %c0_i32_1 = arith.constant 0 : i32
    %c0_i32_2 = arith.constant 0 : i32
    return %c0_i32, %c0_i32_0, %c0_i32_1 : i32, i32, i32
  }
  func.func @transform_3(%arg0: i32) -> (i32, i32, i32) {
    %c0_i32 = arith.constant 0 : i32
    %c0_i32_0 = arith.constant 0 : i32
    %c0_i32_1 = arith.constant 0 : i32
    %c0_i32_2 = arith.constant 0 : i32
    return %c0_i32, %c0_i32_0, %c0_i32_1 : i32, i32, i32
  }
  func.func @transform_4(%arg0: i32) -> (i32, i32) {
    %c0_i32 = arith.constant 0 : i32
    %c0_i32_0 = arith.constant 0 : i32
    %c0_i32_1 = arith.constant 0 : i32
    return %c0_i32, %c0_i32_0 : i32, i32
  }
  func.func @transform_5(%arg0: i32) -> (i32, i32, i32) {
    %c0_i32 = arith.constant 0 : i32
    %c0_i32_0 = arith.constant 0 : i32
    %c0_i32_1 = arith.constant 0 : i32
    return %arg0, %c0_i32, %c0_i32_0 : i32, i32, i32
  }
  func.func @transform_6(%arg0: i32) -> (i32, i32, i32) {
    %c0_i32 = arith.constant 0 : i32
    %c0_i32_0 = arith.constant 0 : i32
    %c0_i32_1 = arith.constant 0 : i32
    return %arg0, %c0_i32, %c0_i32_0 : i32, i32, i32
  }
}

</mosaic_0001>

<bundles_post_ra>
// kernel: tpu_custom_call.1
= control target key start
LH: loop header
LB: loop body
LE: loop exit
PB: predicated region body
PF: predicated region fallthrough
CT: control target
= control target key end

     0   :  { %12 = vsyncpa [#allocation3], 0  ;;  %s956_s24 = smov [#allocation2]   ;;  %s957_s26 = smov 128   ;;  %s1333_s0 = inlined_call_operand.vmem [shape: f32[2,16,8], index: 0, kind: input, shape index: {}]   ;;  %s1334_s1 = inlined_call_operand.vmem [shape: f32[12,8], index: 1, kind: input, shape index: {}]   ;;  %s1335_s2 = inlined_call_operand.vmem [shape: f32[4,8,8], index: 2, kind: input, shape index: {}]   ;;  %s1336_s3 = inlined_call_operand.hbm [shape: f32[4,8,8], index: 3, kind: input, shape index: {}]   ;;  %s1337_s4 = inlined_call_operand.vmem [shape: f32[12,8], index: 4, kind: input, shape index: {}]   ;;  %s1338_s5 = inlined_call_operand.vmem [shape: f32[2,16,8], index: 5, kind: output, shape index: {0}]   ;;  %s1339_s6 = inlined_call_operand.vmem [shape: f32[2,12,8], index: 6, kind: output, shape index: {1}]  }
   0x1   :  { %s23_s23 = sshll.u32 %s1336_s3, 4  ;;  %s25_s25 = sshll.u32 %s956_s24, 4  ;;  %s24_s23 = int_to_ptr.hbm [resolvable:$true] %s23_s23  ;;  %s26_s25 = int_to_ptr.vmem [resolvable:$true] %s25_s25 }
   0x2   :  { %s958_s27 = smov 8  }
   0x3   :  { %31 = dma.hbm_to_vmem [thread:$0]  %s24_s23, 512, %s26_s25, [#allocation3], %s957_s26, %s957_s26, %s958_s27  }
   0x4   :  { %954 = dma.done.wait [#allocation3], 512  }
   0x5   :  { %955 = vsyncadd [#allocation3], 4294966784  ;;  %v146_v0 = vld [vmem:[%s1335_s2] sm:$0xff]  ;;  %v1008_v2 = vld [vmem:[%s1333_s0 + $0x8] sm:$0xff]  ;;  %vm46_vm0 = vcmask 1041408   ;;  %vm88_vm1 = vcmask 1046528  }
   0x6   :  { %v1003_v1 = vld [vmem:[%s1333_s0] sm:$0xff]  ;;  %vm121_vm2 = vcmask 1045504   ;;  %177 = vmatpush.msra.mxu0 %v146_v0  ;;  %v1012_v4 = vrot.slane %v1008_v2, 6  ;;  %v1029_v10 = vld [vmem:[%s1333_s0 + $0x10] sm:$0xff]  ;;  %v1034_v15 = vld [vmem:[%s1333_s0 + $0x18] sm:$0xff]  ;;  %vm149_vm3 = vcmask 64512  }
   0x7   :  { %v47_v3 = vrot.slane %v1003_v1, 6  ;;  %v906_v5 = vld [vmem:[%s1334_s1] ss:$0 sm:$0xff]  ;;  %v907_v6 = vld [vmem:[%s1334_s1 + $0x1] ss:$0 sm:$0xff]  ;;  %v50_v22 = vrot.slane %v1029_v10, 6 }
   0x8   :  { %v908_v9 = vld [vmem:[%s1334_s1 + $0x2] ss:$0 sm:$0xff]  ;;  %v78_v18 = vmul.f32 %v907_v6, %v1012_v4  ;;  %v1040_v23 = vrot.slane %v1034_v15, 6  ;;  %v909_v26 = vld [vmem:[%s1337_s4] ss:$0 sm:$0xff]  ;;  %vm251_vm4 = vcmask 1043456  }
   0x9   :  { %v49_v7 = vsel %vm46_vm0, %v47_v3, %v1012_v4  ;;  %v59_v8 = vsel %vm46_vm0, 0.0, %v47_v3  ;;  %v111_v19 = vmul.f32 %v908_v9, %v1012_v4  ;;  %v60_v31 = vsel %vm46_vm0, 0.0, %v50_v22  ;;  %v195_v3 = vld [vmem:[#allocation2] sm:$0xff] }
   0xa   :  { %v66_v11 = vmul.f32 %v906_v5, %v59_v8  ;;  %v76_v12 = vmul.f32 %v907_v6, %v59_v8  ;;  %v77_v13 = vmul.f32 %v907_v6, %v49_v7  ;;  %v67_v14 = vmul.f32 %v906_v5, %v49_v7  ;;  %225 = vmatpush.msra.mxu1 %v195_v3 }
   0xb   :  { %v109_v16 = vmul.f32 %v908_v9, %v59_v8  ;;  %v110_v17 = vmul.f32 %v908_v9, %v49_v7  ;;  %v92_v27 = vrot.slane %v78_v18, 1  ;;  %v125_v28 = vrot.slane %v111_v19, 2 }
   0xc   :  { %v89_v20 = vrot.slane %v76_v12, 1  ;;  %v90_v21 = vrot.slane %v77_v13, 1  ;;  %v52_v30 = vsel %vm46_vm0, %v50_v22, %v1040_v23  ;;  %v79_v35 = vmul.f32 %v907_v6, %v60_v31 }
   0xd   :  { %v122_v24 = vrot.slane %v109_v16, 2  ;;  %v123_v25 = vrot.slane %v110_v17, 2  ;;  %v80_v36 = vmul.f32 %v907_v6, %v52_v30  ;;  %v112_v42 = vmul.f32 %v908_v9, %v60_v31 }
   0xe   :  { %v91_v29 = vsel %vm88_vm1, %v89_v20, %v90_v21  ;;  %v93_v34 = vsel %vm88_vm1, %v90_v21, %v92_v27  ;;  %v94_v40 = vrot.slane %v79_v35, 1  ;;  %v113_v43 = vmul.f32 %v908_v9, %v52_v30  ;;  %v876_v20 = vld [vmem:[%s1335_s2 + $0x8] sm:$0xff]  ;;  %v911_v21 = vld [vmem:[%s1337_s4 + $0x2] ss:$0 sm:$0xff] }
   0xf   :  { %v103_v32 = vadd.f32 %v91_v29, %v66_v11  ;;  %v124_v33 = vsel %vm121_vm2, %v122_v24, %v123_v25  ;;  %v104_v38 = vadd.f32 %v93_v34, %v67_v14  ;;  %v126_v39 = vsel %vm121_vm2, %v123_v25, %v125_v28  ;;  %380 = vmatpush.msra.mxu2 %v876_v20 }
  0x10   :  { %v95_v41 = vrot.slane %v80_v36, 1  ;;  %v68_v46 = vmul.f32 %v906_v5, %v60_v31  ;;  %v127_v48 = vrot.slane %v112_v42, 2  ;;  %v128_v49 = vrot.slane %v113_v43, 2  ;;  %v913_v31 = vld [vmem:[%s1334_s1 + $0x4] ss:$0 sm:$0xff] }
  0x11   :  { %v136_v37 = vadd.f32 %v124_v33, %v103_v32  ;;  %v137_v45 = vadd.f32 %v126_v39, %v104_v38  ;;  %v81_v50 = vmul.f32 %v907_v6, %v1040_v23  ;;  %v114_v55 = vmul.f32 %v908_v9, %v1040_v23  ;;  %v910_v6 = vld [vmem:[%s1337_s4 + $0x1] ss:$0 sm:$0xff]  ;;  %v914_v33 = vld [vmem:[%s1334_s1 + $0x5] ss:$0 sm:$0xff] }
  0x12   :  { %v96_v47 = vsel %vm88_vm1, %v94_v40, %v95_v41  ;;  %v129_v53 = vsel %vm121_vm2, %v127_v48, %v128_v49  ;;  %v69_v57 = vmul.f32 %v906_v5, %v52_v30  ;;  %vm266_vm5 = vcmask 60416  }
  0x13   :  { %v142_v44 = vadd.f32 %v909_v26, %v136_v37  ;;  %v143_v51 = vadd.f32 %v909_v26, %v137_v45  ;;  %v105_v52 = vadd.f32 %v96_v47, %v68_v46  ;;  %v97_v54 = vrot.slane %v81_v50, 1 }
  0x14   :  { %v130_v59 = vrot.slane %v114_v55, 2  ;;  %vm61_vm6 = vcmask 58368  }
  0x15   :  { %868 = vmatmul.msk.f32.vlgmr.msra.gmra.mxu0 %vm149_vm3, %v142_v44  ;;  %v138_v56 = vadd.f32 %v129_v53, %v105_v52  ;;  %v98_v58 = vsel %vm88_vm1, %v95_v41, %v97_v54  ;;  %v915_v54 = vld [vmem:[%s1337_s4 + $0x3] ss:$0 sm:$0xff]  ;;  %62 = vst.msk [vmem:[%s1339_s6] sm:$0x3] %vm61_vm6, %v1012_v4 }
  0x16   :  { %v106_v61 = vadd.f32 %v98_v58, %v69_v57  ;;  %v131_v62 = vsel %vm121_vm2, %v128_v49, %v130_v59  ;;  %63 = vst.msk [vmem:[%s1339_s6 + $0x10] sm:$0x3] %vm61_vm6, %v1040_v23 }
  0x17   :  { %v144_v60 = vadd.f32 %v909_v26, %v138_v56 }
  0x18   :  { %v139_v63 = vadd.f32 %v131_v62, %v106_v61 }
  0x1a   :  { %v145_v0 = vadd.f32 %v909_v26, %v139_v63 }
  0x1d   :  { %869 = vmatmul.msk.f32.gmra.mxu0 %vm149_vm3, %v143_v51 }
  0x25   :  { %870 = vmatmul.msk.f32.gmra.mxu0 %vm149_vm3, %v144_v60 }
  0x2d   :  { %871 = vmatmul.msk.f32.gmra.mxu0 %vm149_vm3, %v145_v0 }
  0x92   :  { %v179_v5 = vpop.f32.mrf.mxu0 }
  0x93   :  { %v180_v7 = vadd.f32 %v910_v6, %v179_v5 }
  0x95   :  { %v191_v8 = vmax.f32 %v180_v7, 0.0 }
  0x97   :  { %872 = vmatmul.msk.f32.vlgmr.msra.gmra.mxu1 %vm149_vm3, %v191_v8 }
  0x9a   :  { %v182_v9 = vpop.f32.mrf.mxu0 }
  0x9b   :  { %v183_v11 = vadd.f32 %v910_v6, %v182_v9 }
  0x9d   :  { %v192_v12 = vmax.f32 %v183_v11, 0.0 }
  0x9f   :  { %873 = vmatmul.msk.f32.gmra.mxu1 %vm149_vm3, %v192_v12 }
  0xa2   :  { %v185_v13 = vpop.f32.mrf.mxu0 }
  0xa3   :  { %v186_v14 = vadd.f32 %v910_v6, %v185_v13 }
  0xa5   :  { %v193_v16 = vmax.f32 %v186_v14, 0.0 }
  0xa7   :  { %874 = vmatmul.msk.f32.gmra.mxu1 %vm149_vm3, %v193_v16 }
  0xaa   :  { %v188_v17 = vpop.f32.mrf.mxu0 }
  0xab   :  { %v189_v18 = vadd.f32 %v910_v6, %v188_v17 }
  0xad   :  { %v194_v19 = vmax.f32 %v189_v18, 0.0 }
  0xaf   :  { %875 = vmatmul.msk.f32.gmra.mxu1 %vm149_vm3, %v194_v19 }
 0x114   :  { %v227_v22 = vpop.f32.mrf.mxu1 }
 0x115   :  { %v228_v24 = vadd.f32 %v911_v21, %v227_v22 }
 0x117   :  { %v1076_v25 = vadd.f32 %v228_v24, %v1003_v1 }
 0x119   :  { %v243_v26 = vmax.f32 %v1076_v25, 0.0 }
 0x11b   :  { %v252_v28 = vrot.slane %v243_v26, 4 }
 0x11c   :  { %v230_v27 = vpop.f32.mrf.mxu1 }
 0x11d   :  { %v231_v29 = vadd.f32 %v911_v21, %v230_v27  ;;  %v264_v32 = vsel %vm251_vm4, 0.0, %v252_v28 }
 0x11e   :  { %v281_v35 = vmul.f32 %v913_v31, %v264_v32  ;;  %v313_v40 = vmul.f32 %v914_v33, %v264_v32 }
 0x11f   :  { %v1082_v30 = vadd.f32 %v231_v29, %v1008_v2  ;;  %v912_v2 = vld [vmem:[%s1334_s1 + $0x3] ss:$0 sm:$0xff] }
 0x120   :  { %v293_v44 = vrot.slane %v281_v35, 2  ;;  %v271_v48 = vmul.f32 %v912_v2, %v264_v32  ;;  %v325_v50 = vrot.slane %v313_v40, 4 }
 0x121   :  { %v244_v1 = vmax.f32 %v1082_v30, 0.0  ;;  %v918_v30 = vld [vmem:[%s1334_s1 + $0x6] ss:$0 sm:$0xff] }
 0x123   :  { %v253_v34 = vrot.slane %v244_v1, 4 }
 0x124   :  { %v233_v36 = vpop.f32.mrf.mxu1 }
 0x125   :  { %v254_v37 = vsel %vm251_vm4, %v252_v28, %v253_v34  ;;  %267 = vst.msk [vmem:[%s1339_s6 + $0x2] sm:$0xf] %vm266_vm5, %v253_v34  ;;  %v283_v38 = vmul.f32 %v913_v31, %v253_v34  ;;  %v234_v39 = vadd.f32 %v911_v21, %v233_v36  ;;  %v315_v52 = vmul.f32 %v914_v33, %v253_v34 }
 0x126   :  { %v282_v41 = vmul.f32 %v913_v31, %v254_v37  ;;  %v314_v42 = vmul.f32 %v914_v33, %v254_v37  ;;  %v272_v60 = vmul.f32 %v912_v2, %v254_v37 }
 0x127   :  { %v1103_v43 = vadd.f32 %v234_v39, %v1029_v10  ;;  %v296_v47 = vrot.slane %v283_v38, 2  ;;  %v328_v61 = vrot.slane %v315_v52, 4 }
 0x128   :  { %v294_v45 = vrot.slane %v282_v41, 2  ;;  %v326_v46 = vrot.slane %v314_v42, 4  ;;  %v399_v41 = vld [vmem:[#allocation2 + $0x8] sm:$0xff] }
 0x129   :  { %v245_v49 = vmax.f32 %v1103_v43, 0.0  ;;  %429 = vmatpush.msra.mxu3 %v399_v41  ;;  %v921_v43 = vld [vmem:[%s1337_s4 + $0x6] ss:$0 sm:$0xff] }
 0x12a   :  { %v295_v51 = vsel %vm121_vm2, %v293_v44, %v294_v45  ;;  %v327_v10 = vsel %vm251_vm4, %v325_v50, %v326_v46  ;;  %v297_v56 = vsel %vm121_vm2, %v294_v45, %v296_v47  ;;  %v329_v5 = vsel %vm251_vm4, %v326_v46, %v328_v61 }
 0x12b   :  { %v307_v53 = vadd.f32 %v295_v51, %v271_v48  ;;  %v255_v57 = vrot.slane %v245_v49, 4  ;;  %v308_v0 = vadd.f32 %v297_v56, %v272_v60 }
 0x12c   :  { %v236_v55 = vpop.f32.mrf.mxu1 }
 0x12d   :  { %v237_v58 = vadd.f32 %v911_v21, %v236_v55  ;;  %v339_v59 = vadd.f32 %v327_v10, %v307_v53  ;;  %v265_v3 = vsel %vm251_vm4, 0.0, %v255_v57  ;;  %v340_v8 = vadd.f32 %v329_v5, %v308_v0  ;;  %v917_v10 = vld [vmem:[%s1337_s4 + $0x5] ss:$0 sm:$0xff] }
 0x12e   :  { %v284_v9 = vmul.f32 %v913_v31, %v265_v3  ;;  %v316_v12 = vmul.f32 %v914_v33, %v265_v3  ;;  %v273_v21 = vmul.f32 %v912_v2, %v265_v3 }
 0x12f   :  { %v1115_v62 = vadd.f32 %v237_v58, %v1034_v15  ;;  %v345_v63 = vadd.f32 %v915_v54, %v339_v59  ;;  %v346_v16 = vadd.f32 %v915_v54, %v340_v8 }
 0x130   :  { %v298_v17 = vrot.slane %v284_v9, 2  ;;  %v330_v22 = vrot.slane %v316_v12, 4 }
 0x131   :  { %v246_v6 = vmax.f32 %v1115_v62, 0.0  ;;  %877 = vmatmul.msk.f32.vlgmr.msra.gmra.mxu2 %vm149_vm3, %v345_v63  ;;  %v919_v63 = vld [vmem:[%s1334_s1 + $0x7] ss:$0 sm:$0xff] }
 0x133   :  { %v256_v7 = vrot.slane %v246_v6, 4 }
 0x135   :  { %v257_v11 = vsel %vm251_vm4, %v255_v57, %v256_v7  ;;  %268 = vst.msk [vmem:[%s1339_s6 + $0x12] sm:$0xf] %vm266_vm5, %v256_v7  ;;  %v286_v15 = vmul.f32 %v913_v31, %v256_v7  ;;  %v318_v27 = vmul.f32 %v914_v33, %v256_v7 }
 0x136   :  { %v285_v13 = vmul.f32 %v913_v31, %v257_v11  ;;  %v317_v14 = vmul.f32 %v914_v33, %v257_v11  ;;  %v274_v31 = vmul.f32 %v912_v2, %v257_v11  ;;  %v916_v33 = vld [vmem:[%s1337_s4 + $0x4] ss:$0 sm:$0xff]  ;;  %v885_v2 = vld [vmem:[%s1335_s2 + $0x10] sm:$0xff] }
 0x137   :  { %v301_v20 = vrot.slane %v286_v15, 2  ;;  %v333_v35 = vrot.slane %v318_v27, 4  ;;  %582 = vmatpush.msrb.mxu0 %v885_v2 }
 0x138   :  { %v299_v18 = vrot.slane %v285_v13, 2  ;;  %v331_v19 = vrot.slane %v317_v14, 4 }
 0x139   :  { %878 = vmatmul.msk.f32.gmra.mxu2 %vm149_vm3, %v346_v16 }
 0x13a   :  { %v300_v24 = vsel %vm121_vm2, %v298_v17, %v299_v18  ;;  %v332_v29 = vsel %vm251_vm4, %v330_v22, %v331_v19  ;;  %v302_v32 = vsel %vm121_vm2, %v299_v18, %v301_v20  ;;  %v334_v38 = vsel %vm251_vm4, %v331_v19, %v333_v35 }
 0x13b   :  { %v309_v28 = vadd.f32 %v300_v24, %v273_v21  ;;  %v310_v37 = vadd.f32 %v302_v32, %v274_v31  ;;  %v601_v21 = vld [vmem:[#allocation2 + $0x10] sm:$0xff] }
 0x13c   :  { %631 = vmatpush.msrb.mxu1 %v601_v21 }
 0x13d   :  { %v341_v34 = vadd.f32 %v332_v29, %v309_v28  ;;  %v342_v39 = vadd.f32 %v334_v38, %v310_v37 }
 0x13f   :  { %v347_v36 = vadd.f32 %v915_v54, %v341_v34  ;;  %v348_v40 = vadd.f32 %v915_v54, %v342_v39 }
 0x141   :  { %879 = vmatmul.msk.f32.gmra.mxu2 %vm149_vm3, %v347_v36 }
 0x149   :  { %880 = vmatmul.msk.f32.gmra.mxu2 %vm149_vm3, %v348_v40 }
 0x1b4   :  { %v382_v42 = vpop.f32.mrf.mxu2 }
 0x1b5   :  { %v383_v44 = vadd.f32 %v916_v33, %v382_v42 }
 0x1b7   :  { %v394_v45 = vmax.f32 %v383_v44, 0.0 }
 0x1b9   :  { %881 = vmatmul.msk.f32.vlgmr.msra.gmra.mxu3 %vm149_vm3, %v394_v45 }
 0x1bc   :  { %v385_v46 = vpop.f32.mrf.mxu2 }
 0x1bd   :  { %v386_v47 = vadd.f32 %v916_v33, %v385_v46 }
 0x1bf   :  { %v395_v48 = vmax.f32 %v386_v47, 0.0 }
 0x1c1   :  { %882 = vmatmul.msk.f32.gmra.mxu3 %vm149_vm3, %v395_v48 }
 0x1c4   :  { %v388_v50 = vpop.f32.mrf.mxu2 }
 0x1c5   :  { %v389_v51 = vadd.f32 %v916_v33, %v388_v50 }
 0x1c7   :  { %v396_v52 = vmax.f32 %v389_v51, 0.0 }
 0x1c9   :  { %883 = vmatmul.msk.f32.gmra.mxu3 %vm149_vm3, %v396_v52 }
 0x1cc   :  { %v391_v53 = vpop.f32.mrf.mxu2 }
 0x1cd   :  { %v392_v54 = vadd.f32 %v916_v33, %v391_v53 }
 0x1cf   :  { %v397_v55 = vmax.f32 %v392_v54, 0.0 }
 0x1d1   :  { %884 = vmatmul.msk.f32.gmra.mxu3 %vm149_vm3, %v397_v55 }
 0x23c   :  { %v431_v56 = vpop.f32.mrf.mxu3 }
 0x23d   :  { %v432_v57 = vadd.f32 %v917_v10, %v431_v56 }
 0x23f   :  { %v1160_v58 = vadd.f32 %v432_v57, %v243_v26  ;;  %v920_v26 = vld [vmem:[%s1334_s1 + $0x8] ss:$0 sm:$0xff] }
 0x241   :  { %v447_v59 = vmax.f32 %v1160_v58, 0.0 }
 0x243   :  { %v455_v4 = vrot.slane %v447_v59, 6 }
 0x244   :  { %v434_v60 = vpop.f32.mrf.mxu3 }
 0x245   :  { %v435_v61 = vadd.f32 %v917_v10, %v434_v60  ;;  %v467_v0 = vsel %vm46_vm0, 0.0, %v455_v4 }
 0x246   :  { %v483_v5 = vmul.f32 %v919_v63, %v467_v0  ;;  %v515_v11 = vmul.f32 %v920_v26, %v467_v0  ;;  %v473_v19 = vmul.f32 %v918_v30, %v467_v0 }
 0x247   :  { %v1167_v23 = vadd.f32 %v435_v61, %v244_v1 }
 0x248   :  { %v495_v14 = vrot.slane %v483_v5, 1  ;;  %v527_v22 = vrot.slane %v515_v11, 2  ;;  %v894_v11 = vld [vmem:[%s1335_s2 + $0x18] sm:$0xff] }
 0x249   :  { %v448_v25 = vmax.f32 %v1167_v23, 0.0  ;;  %784 = vmatpush.msrb.mxu2 %v894_v11  ;;  %v924_v23 = vld [vmem:[%s1334_s1 + $0x9] ss:$0 sm:$0xff] }
 0x24b   :  { %v456_v3 = vrot.slane %v448_v25, 6 }
 0x24c   :  { %v437_v7 = vpop.f32.mrf.mxu3 }
 0x24d   :  { %v457_v1 = vsel %vm46_vm0, %v455_v4, %v456_v3  ;;  %469 = vst.msk [vmem:[%s1339_s6 + $0x6] sm:$0x3] %vm61_vm6, %v456_v3  ;;  %v485_v8 = vmul.f32 %v919_v63, %v456_v3  ;;  %v438_v9 = vadd.f32 %v917_v10, %v437_v7  ;;  %v517_v27 = vmul.f32 %v920_v26, %v456_v3 }
 0x24e   :  { %v484_v15 = vmul.f32 %v919_v63, %v457_v1  ;;  %v516_v12 = vmul.f32 %v920_v26, %v457_v1  ;;  %v474_v36 = vmul.f32 %v918_v30, %v457_v1 }
 0x24f   :  { %v1189_v13 = vadd.f32 %v438_v9, %v245_v49  ;;  %v498_v18 = vrot.slane %v485_v8, 1  ;;  %v530_v37 = vrot.slane %v517_v27, 2 }
 0x250   :  { %v496_v16 = vrot.slane %v484_v15, 1  ;;  %v528_v17 = vrot.slane %v516_v12, 2 }
 0x251   :  { %v449_v20 = vmax.f32 %v1189_v13, 0.0  ;;  %v927_v13 = vld [vmem:[%s1337_s4 + $0x9] ss:$0 sm:$0xff] }
 0x252   :  { %v497_v24 = vsel %vm88_vm1, %v495_v14, %v496_v16  ;;  %v529_v29 = vsel %vm121_vm2, %v527_v22, %v528_v17  ;;  %v499_v32 = vsel %vm88_vm1, %v496_v16, %v498_v18  ;;  %v531_v2 = vsel %vm121_vm2, %v528_v17, %v530_v37  ;;  %v925_v37 = vld [vmem:[%s1334_s1 + $0xa] ss:$0 sm:$0xff] }
 0x253   :  { %v509_v28 = vadd.f32 %v497_v24, %v473_v19  ;;  %v458_v34 = vrot.slane %v449_v20, 6  ;;  %v510_v40 = vadd.f32 %v499_v32, %v474_v36 }
 0x254   :  { %v440_v49 = vpop.f32.mrf.mxu3 }
 0x255   :  { %v441_v31 = vadd.f32 %v917_v10, %v440_v49  ;;  %v541_v35 = vadd.f32 %v529_v29, %v509_v28  ;;  %v468_v41 = vsel %vm46_vm0, 0.0, %v458_v34  ;;  %v542_v44 = vadd.f32 %v531_v2, %v510_v40  ;;  %v923_v28 = vld [vmem:[%s1337_s4 + $0x8] ss:$0 sm:$0xff] }
 0x256   :  { %v486_v45 = vmul.f32 %v919_v63, %v468_v41  ;;  %v475_v55 = vmul.f32 %v918_v30, %v468_v41 }
 0x257   :  { %v1202_v38 = vadd.f32 %v441_v31, %v246_v6  ;;  %v547_v39 = vadd.f32 %v921_v43, %v541_v35  ;;  %v518_v6 = vmul.f32 %v920_v26, %v468_v41  ;;  %v548_v50 = vadd.f32 %v921_v43, %v542_v44 }
 0x258   :  { %v500_v51 = vrot.slane %v486_v45, 1 }
 0x259   :  { %v450_v33 = vmax.f32 %v1202_v38, 0.0  ;;  %886 = vmatmul.msk.f32.vlgmr.msrb.gmra.mxu0 %vm149_vm3, %v547_v39  ;;  %v532_v10 = vrot.slane %v518_v6, 2 }
 0x25b   :  { %v459_v42 = vrot.slane %v450_v33, 6 }
 0x25d   :  { %v460_v46 = vsel %vm46_vm0, %v458_v34, %v459_v42  ;;  %470 = vst.msk [vmem:[%s1339_s6 + $0x16] sm:$0x3] %vm61_vm6, %v459_v42  ;;  %v488_v62 = vmul.f32 %v919_v63, %v459_v42  ;;  %v520_v57 = vmul.f32 %v920_v26, %v459_v42 }
 0x25e   :  { %v487_v47 = vmul.f32 %v919_v63, %v460_v46  ;;  %v519_v48 = vmul.f32 %v920_v26, %v460_v46  ;;  %v476_v63 = vmul.f32 %v918_v30, %v460_v46  ;;  %v922_v26 = vld [vmem:[%s1337_s4 + $0x7] ss:$0 sm:$0xff] }
 0x25f   :  { %v503_v54 = vrot.slane %v488_v62, 1  ;;  %v535_v3 = vrot.slane %v520_v57, 2 }
 0x260   :  { %v501_v52 = vrot.slane %v487_v47, 1  ;;  %v533_v53 = vrot.slane %v519_v48, 2 }
 0x261   :  { %887 = vmatmul.msk.f32.gmra.mxu0 %vm149_vm3, %v548_v50 }
 0x262   :  { %v502_v56 = vsel %vm88_vm1, %v500_v51, %v501_v52  ;;  %v534_v4 = vsel %vm121_vm2, %v532_v10, %v533_v53  ;;  %v504_v61 = vsel %vm88_vm1, %v501_v52, %v503_v54  ;;  %v536_v1 = vsel %vm121_vm2, %v533_v53, %v535_v3  ;;  %v803_v54 = vld [vmem:[#allocation2 + $0x18] sm:$0xff] }
 0x263   :  { %v511_v60 = vadd.f32 %v502_v56, %v475_v55  ;;  %v512_v7 = vadd.f32 %v504_v61, %v476_v63  ;;  %833 = vmatpush.msrb.mxu3 %v803_v54 }
 0x265   :  { %v543_v0 = vadd.f32 %v534_v4, %v511_v60  ;;  %v544_v8 = vadd.f32 %v536_v1, %v512_v7 }
 0x267   :  { %v549_v5 = vadd.f32 %v921_v43, %v543_v0  ;;  %v550_v9 = vadd.f32 %v921_v43, %v544_v8 }
 0x269   :  { %888 = vmatmul.msk.f32.gmra.mxu0 %vm149_vm3, %v549_v5 }
 0x271   :  { %889 = vmatmul.msk.f32.gmra.mxu0 %vm149_vm3, %v550_v9 }
 0x2d6   :  { %v584_v30 = vpop.f32.mrf.mxu0 }
 0x2d7   :  { %v585_v15 = vadd.f32 %v922_v26, %v584_v30 }
 0x2d9   :  { %v596_v12 = vmax.f32 %v585_v15, 0.0 }
 0x2db   :  { %890 = vmatmul.msk.f32.vlgmr.msrb.gmra.mxu1 %vm149_vm3, %v596_v12 }
 0x2de   :  { %v587_v14 = vpop.f32.mrf.mxu0 }
 0x2df   :  { %v588_v16 = vadd.f32 %v922_v26, %v587_v14 }
 0x2e1   :  { %v597_v17 = vmax.f32 %v588_v16, 0.0 }
 0x2e3   :  { %891 = vmatmul.msk.f32.gmra.mxu1 %vm149_vm3, %v597_v17 }
 0x2e6   :  { %v590_v18 = vpop.f32.mrf.mxu0 }
 0x2e7   :  { %v591_v19 = vadd.f32 %v922_v26, %v590_v18 }
 0x2e9   :  { %v598_v21 = vmax.f32 %v591_v19, 0.0 }
 0x2eb   :  { %892 = vmatmul.msk.f32.gmra.mxu1 %vm149_vm3, %v598_v21 }
 0x2ee   :  { %v593_v22 = vpop.f32.mrf.mxu0 }
 0x2ef   :  { %v594_v24 = vadd.f32 %v922_v26, %v593_v22 }
 0x2f1   :  { %v599_v27 = vmax.f32 %v594_v24, 0.0 }
 0x2f3   :  { %893 = vmatmul.msk.f32.gmra.mxu1 %vm149_vm3, %v599_v27 }
 0x358   :  { %v633_v43 = vpop.f32.mrf.mxu1 }
 0x359   :  { %v634_v49 = vadd.f32 %v923_v28, %v633_v43 }
 0x35b   :  { %v1237_v29 = vadd.f32 %v634_v49, %v447_v59  ;;  %v926_v59 = vld [vmem:[%s1334_s1 + $0xb] ss:$0 sm:$0xff] }
 0x35d   :  { %v649_v32 = vmax.f32 %v1237_v29, 0.0 }
 0x35f   :  { %v657_v31 = vrot.slane %v649_v32, 4 }
 0x360   :  { %v636_v34 = vpop.f32.mrf.mxu1 }
 0x361   :  { %v637_v35 = vadd.f32 %v923_v28, %v636_v34  ;;  %v669_v39 = vsel %vm251_vm4, 0.0, %v657_v31 }
 0x362   :  { %v685_v41 = vmul.f32 %v925_v37, %v669_v39  ;;  %v717_v45 = vmul.f32 %v926_v59, %v669_v39  ;;  %v675_v52 = vmul.f32 %v924_v23, %v669_v39 }
 0x363   :  { %v1244_v36 = vadd.f32 %v637_v35, %v448_v25 }
 0x364   :  { %v697_v47 = vrot.slane %v685_v41, 2  ;;  %v729_v55 = vrot.slane %v717_v45, 4 }
 0x365   :  { %v650_v58 = vmax.f32 %v1244_v36, 0.0 }
 0x367   :  { %v658_v40 = vrot.slane %v650_v58, 4 }
 0x368   :  { %v639_v2 = vpop.f32.mrf.mxu1 }
 0x369   :  { %v659_v25 = vsel %vm251_vm4, %v657_v31, %v658_v40  ;;  %671 = vst.msk [vmem:[%s1339_s6 + $0x8] sm:$0xf] %vm266_vm5, %v658_v40  ;;  %v687_v42 = vmul.f32 %v925_v37, %v658_v40  ;;  %v640_v44 = vadd.f32 %v923_v28, %v639_v2  ;;  %v719_v56 = vmul.f32 %v926_v59, %v658_v40 }
 0x36a   :  { %v686_v46 = vmul.f32 %v925_v37, %v659_v25  ;;  %v718_v62 = vmul.f32 %v926_v59, %v659_v25  ;;  %v676_v3 = vmul.f32 %v924_v23, %v659_v25 }
 0x36b   :  { %v1266_v6 = vadd.f32 %v640_v44, %v449_v20  ;;  %v700_v51 = vrot.slane %v687_v42, 2  ;;  %v732_v5 = vrot.slane %v719_v56, 4  ;;  %v929_v56 = vld [vmem:[%s1337_s4 + $0xb] ss:$0 sm:$0xff] }
 0x36c   :  { %v698_v48 = vrot.slane %v686_v46, 2  ;;  %v730_v50 = vrot.slane %v718_v62, 4 }
 0x36d   :  { %v651_v53 = vmax.f32 %v1266_v6, 0.0 }
 0x36e   :  { %v699_v10 = vsel %vm121_vm2, %v697_v47, %v698_v48  ;;  %v731_v60 = vsel %vm251_vm4, %v729_v55, %v730_v50  ;;  %v701_v4 = vsel %vm121_vm2, %v698_v48, %v700_v51  ;;  %v733_v11 = vsel %vm251_vm4, %v730_v50, %v732_v5 }
 0x36f   :  { %v711_v57 = vadd.f32 %v699_v10, %v675_v52  ;;  %v660_v61 = vrot.slane %v651_v53, 4  ;;  %v712_v8 = vadd.f32 %v701_v4, %v676_v3 }
 0x370   :  { %v642_v20 = vpop.f32.mrf.mxu1 }
 0x371   :  { %v643_v0 = vadd.f32 %v923_v28, %v642_v20  ;;  %v743_v63 = vadd.f32 %v731_v60, %v711_v57  ;;  %v670_v9 = vsel %vm251_vm4, 0.0, %v660_v61  ;;  %v744_v15 = vadd.f32 %v733_v11, %v712_v8 }
 0x372   :  { %v688_v12 = vmul.f32 %v925_v37, %v670_v9  ;;  %v677_v27 = vmul.f32 %v924_v23, %v670_v9 }
 0x373   :  { %v1279_v7 = vadd.f32 %v643_v0, %v450_v33  ;;  %v749_v1 = vadd.f32 %v927_v13, %v743_v63  ;;  %v720_v33 = vmul.f32 %v926_v59, %v670_v9  ;;  %v750_v18 = vadd.f32 %v927_v13, %v744_v15 }
 0x374   :  { %v702_v19 = vrot.slane %v688_v12, 2 }
 0x375   :  { %v652_v26 = vmax.f32 %v1279_v7, 0.0  ;;  %895 = vmatmul.msk.f32.vlgmr.msrb.gmra.mxu2 %vm149_vm3, %v749_v1  ;;  %v734_v28 = vrot.slane %v720_v33, 4 }
 0x377   :  { %v661_v30 = vrot.slane %v652_v26, 4 }
 0x379   :  { %v662_v14 = vsel %vm251_vm4, %v660_v61, %v661_v30  ;;  %672 = vst.msk [vmem:[%s1339_s6 + $0x18] sm:$0xf] %vm266_vm5, %v661_v30  ;;  %v690_v38 = vmul.f32 %v925_v37, %v661_v30  ;;  %v722_v49 = vmul.f32 %v926_v59, %v661_v30 }
 0x37a   :  { %v689_v16 = vmul.f32 %v925_v37, %v662_v14  ;;  %v721_v17 = vmul.f32 %v926_v59, %v662_v14  ;;  %v678_v37 = vmul.f32 %v924_v23, %v662_v14  ;;  %v928_v59 = vld [vmem:[%s1337_s4 + $0xa] ss:$0 sm:$0xff] }
 0x37b   :  { %v705_v24 = vrot.slane %v690_v38, 2  ;;  %v737_v40 = vrot.slane %v722_v49, 4 }
 0x37c   :  { %v703_v21 = vrot.slane %v689_v16, 2  ;;  %v735_v22 = vrot.slane %v721_v17, 4 }
 0x37d   :  { %896 = vmatmul.msk.f32.gmra.mxu2 %vm149_vm3, %v750_v18 }
 0x37e   :  { %v704_v43 = vsel %vm121_vm2, %v702_v19, %v703_v21  ;;  %v736_v31 = vsel %vm251_vm4, %v734_v28, %v735_v22  ;;  %v706_v35 = vsel %vm121_vm2, %v703_v21, %v705_v24  ;;  %v738_v25 = vsel %vm251_vm4, %v735_v22, %v737_v40 }
 0x37f   :  { %v713_v34 = vadd.f32 %v704_v43, %v677_v27  ;;  %v714_v2 = vadd.f32 %v706_v35, %v678_v37 }
 0x381   :  { %v745_v39 = vadd.f32 %v736_v31, %v713_v34  ;;  %v746_v42 = vadd.f32 %v738_v25, %v714_v2 }
 0x383   :  { %v751_v41 = vadd.f32 %v927_v13, %v745_v39  ;;  %v752_v44 = vadd.f32 %v927_v13, %v746_v42 }
 0x385   :  { %897 = vmatmul.msk.f32.gmra.mxu2 %vm149_vm3, %v751_v41 }
 0x38d   :  { %898 = vmatmul.msk.f32.gmra.mxu2 %vm149_vm3, %v752_v44 }
 0x3f8   :  { %v786_v45 = vpop.f32.mrf.mxu2 }
 0x3f9   :  { %v787_v46 = vadd.f32 %v928_v59, %v786_v45 }
 0x3fb   :  { %v798_v62 = vmax.f32 %v787_v46, 0.0 }
 0x3fd   :  { %899 = vmatmul.msk.f32.vlgmr.msrb.gmra.mxu3 %vm149_vm3, %v798_v62 }
 0x400   :  { %v789_v23 = vpop.f32.mrf.mxu2 }
 0x401   :  { %v790_v47 = vadd.f32 %v928_v59, %v789_v23 }
 0x403   :  { %v799_v48 = vmax.f32 %v790_v47, 0.0 }
 0x405   :  { %900 = vmatmul.msk.f32.gmra.mxu3 %vm149_vm3, %v799_v48 }
 0x408   :  { %v792_v50 = vpop.f32.mrf.mxu2 }
 0x409   :  { %v793_v51 = vadd.f32 %v928_v59, %v792_v50 }
 0x40b   :  { %v800_v52 = vmax.f32 %v793_v51, 0.0 }
 0x40d   :  { %901 = vmatmul.msk.f32.gmra.mxu3 %vm149_vm3, %v800_v52 }
 0x410   :  { %v795_v54 = vpop.f32.mrf.mxu2 }
 0x411   :  { %v796_v55 = vadd.f32 %v928_v59, %v795_v54 }
 0x413   :  { %v801_v10 = vmax.f32 %v796_v55, 0.0 }
 0x415   :  { %902 = vmatmul.msk.f32.gmra.mxu3 %vm149_vm3, %v801_v10 }
 0x480   :  { %v835_v57 = vpop.f32.mrf.mxu3 }
 0x481   :  { %v836_v13 = vadd.f32 %v929_v56, %v835_v57 }
 0x483   :  { %v847_v20 = vadd.f32 %v836_v13, %v649_v32 }
 0x485   :  { %v851_v60 = vmax.f32 %v847_v20, 0.0 }
 0x487   :  { %855 = vst.msk [vmem:[%s1338_s5] sm:$0xff] %vm149_vm3, %v851_v60 }
 0x488   :  { %v838_v4 = vpop.f32.mrf.mxu3 }
 0x489   :  { %v839_v61 = vadd.f32 %v929_v56, %v838_v4 }
 0x48b   :  { %v848_v0 = vadd.f32 %v839_v61, %v650_v58 }
 0x48d   :  { %v852_v63 = vmax.f32 %v848_v0, 0.0 }
 0x48f   :  { %856 = vst.msk [vmem:[%s1338_s5 + $0x8] sm:$0xff] %vm149_vm3, %v852_v63 }
 0x490   :  { %v841_v3 = vpop.f32.mrf.mxu3 }
 0x491   :  { %v842_v29 = vadd.f32 %v929_v56, %v841_v3 }
 0x493   :  { %v849_v32 = vadd.f32 %v842_v29, %v651_v53 }
 0x495   :  { %v853_v5 = vmax.f32 %v849_v32, 0.0 }
 0x497   :  { %857 = vst.msk [vmem:[%s1338_s5 + $0x10] sm:$0xff] %vm149_vm3, %v853_v5 }
 0x498   :  { %v844_v1 = vpop.f32.mrf.mxu3 }
 0x499   :  { %v845_v36 = vadd.f32 %v929_v56, %v844_v1 }
 0x49b   :  { %v850_v58 = vadd.f32 %v845_v36, %v652_v26 }
 0x49d   :  { %v854_v8 = vmax.f32 %v850_v58, 0.0 }
 0x49f   :  { %858 = vst.msk [vmem:[%s1338_s5 + $0x18] sm:$0xff] %vm149_vm3, %v854_v8 }
 0x4a0   :  { %867 = vsyncpa [#allocation3], 1 }

</bundles_post_ra>
